<compile_context>
chip_gen: v7x
topology: tpu7x:2x2x1
jax: 0.10.0
libtpu: 0.0.40
codegen_flags: <defaults>
</compile_context>

<pallas_src>
import jax
import jax.numpy as jnp
from jax.experimental import pallas as pl
from jax.experimental.pallas import tpu as pltpu


# ---------------------------------------------------------------------------
# Kernel
# ---------------------------------------------------------------------------
def mlp_kernel(p_ref, x_ref, o_ref):
    x = x_ref[...]                                   # (8, TB)  batch on lanes

    # Static views into the packed parameter slab (zero runtime cost).
    w1 = p_ref[0:8, 0:8]
    b1 = p_ref[0:8, 8:9]
    w2 = p_ref[8:16, 0:8]
    b2 = p_ref[8:16, 8:9]
    w3 = p_ref[16:24, 0:8]
    b3 = p_ref[16:24, 8:9]

    # Layer 1: Linear(8 -> 6) + ReLU    (padded rows 6..7 stay exactly 0)
    h1 = jnp.maximum(
        jnp.dot(w1, x, preferred_element_type=jnp.float32) + b1, 0.0)   # (8, TB)
    # Layer 2: Linear(6 -> 4) + ReLU    (padded rows 4..7 stay exactly 0)
    h2 = jnp.maximum(
        jnp.dot(w2, h1, preferred_element_type=jnp.float32) + b2, 0.0)  # (8, TB)
    # Layer 3: Linear(4 -> 1) + Sigmoid (only row 0 is meaningful)
    h3 = jnp.dot(w3, h2, preferred_element_type=jnp.float32) + b3       # (8, TB)

    # Slice row 0 first so sigmoid (EUP) runs on 1/8th of the data.
    o_ref[...] = jax.nn.sigmoid(h3[0:1, :])                             # (1, TB)


# ---------------------------------------------------------------------------
# Host-side helpers
# ---------------------------------------------------------------------------
def pack_params(w1, b1, w2, b2, w3, b3):
    """Pack PyTorch-layout (out,in) weights and (out,) biases into one
    (24, 16) f32 slab. Each layer occupies an 8-row band: weight zero-padded
    to (8, 8) in cols 0:8, bias zero-padded to (8, 1) in col 8."""
    slab = jnp.zeros((24, 16), jnp.float32)

    def put(slab, row0, w, b):
        o, i = w.shape
        slab = slab.at[row0:row0 + o, 0:i].set(w.astype(jnp.float32))
        slab = slab.at[row0:row0 + o, 8:9].set(b.reshape(o, 1).astype(jnp.float32))
        return slab

    slab = put(slab, 0, w1, b1)
    slab = put(slab, 8, w2, b2)
    slab = put(slab, 16, w3, b3)
    return slab


def mlp_forward(x, param_slab, *, block_b=1024):
    """x: (B, 8) f32, param_slab: (24, 16) f32  ->  (B, 1) f32."""
    assert block_b % 128 == 0
    B = x.shape[0]

    # Layout plumbing: batch goes on the lane axis.
    xt = jnp.transpose(x)                                   # (8, B)
    TB = min(block_b, pl.cdiv(B, 128) * 128)                # lane tile (mult of 128)
    Bp = pl.cdiv(B, TB) * TB
    if Bp != B:
        xt = jnp.pad(xt, ((0, 0), (0, Bp - B)))

    out = pl.pallas_call(
        mlp_kernel,
        out_shape=jax.ShapeDtypeStruct((1, Bp), jnp.float32),
        grid=(Bp // TB,),
        in_specs=[
            # Parameter slab: same block every step -> stays VMEM-resident.
            pl.BlockSpec((24, 16), lambda i: (0, 0)),
            # Activations: tile the lane (batch) axis; double-buffered DMA.
            pl.BlockSpec((8, TB), lambda i: (0, i)),
        ],
        out_specs=pl.BlockSpec((1, TB), lambda i: (0, i)),
        compiler_params=pltpu.CompilerParams(
            dimension_semantics=("parallel",)),   # megacore sharding on v7x
    )(param_slab, xt)

    # (1, B) -> (B, 1): degenerate transpose (layout-free).
    return jnp.transpose(out[:, :B])


def init_params(key):
    """Deterministic init matching torch.nn.Linear (PyTorch (out,in) layout)."""
    dims = [(6, 8), (4, 6), (1, 4)]
    params = []
    for i, (fan_out, fan_in) in enumerate(dims):
        kw, kb, key = jax.random.split(jax.random.fold_in(key, i), 3)
        bound = 1.0 / jnp.sqrt(fan_in)
        w = jax.random.uniform(kw, (fan_out, fan_in), jnp.float32, -bound, bound)
        b = jax.random.uniform(kb, (fan_out,), jnp.float32, -bound, bound)
        params += [w, b]
    return params


# ---------------------------------------------------------------------------
# Demo / correctness check
# ---------------------------------------------------------------------------
if __name__ == "__main__":
    key = jax.random.PRNGKey(0)
    kx, kp = jax.random.split(key)

    B = 256
    x = jax.random.normal(kx, (B, 8), dtype=jnp.float32)
    w1, b1, w2, b2, w3, b3 = init_params(kp)
    slab = pack_params(w1, b1, w2, b2, w3, b3)

    # block_b=128 -> 2 grid steps, exercising the pipelined batch tiling.
    y = mlp_forward(x, slab, block_b=128)
    jax.block_until_ready(y)

    # Reference in plain JAX (PyTorch semantics: x @ W^T + b).
    h1 = jnp.maximum(x @ w1.T + b1, 0.0)
    h2 = jnp.maximum(h1 @ w2.T + b2, 0.0)
    y_ref = jax.nn.sigmoid(h2 @ w3.T + b3)

    assert y.shape == (B, 1)
    assert jnp.allclose(y, y_ref, atol=1e-5, rtol=1e-5)

    print("KERNEL_OK")
</pallas_src>

<mosaic_0001>
module attributes {stable_mosaic.version = 11 : i64} {
  func.func @mlp_kernel(%arg0: i32, %arg1: memref<24x16xf32, #tpu.memory_space<vmem>>, %arg2: memref<8x128xf32, #tpu.memory_space<vmem>>, %arg3: memref<1x128xf32, #tpu.memory_space<vmem>>) attributes {dimension_semantics = [#tpu.dimension_semantics<parallel>], iteration_bounds = array<i64: 2>, scalar_prefetch = 0 : i64, scratch_operands = 0 : i64, tpu.core_type = #tpu.core_type<tc>, window_params = [{pipeline_mode = #tpu.pipeline_mode<synchronous>, transform_indices = @transform_0, window_bounds = array<i64: 24, 16>}, {transform_indices = @transform_1, window_bounds = array<i64: 8, 128>}, {transform_indices = @transform_2, window_bounds = array<i64: 1, 128>}]} {
    %c0 = arith.constant 0 : index
    %c0_0 = arith.constant 0 : index
    %0 = vector.load %arg2[%c0, %c0_0] : memref<8x128xf32, #tpu.memory_space<vmem>>, vector<8x128xf32>
    %c0_1 = arith.constant 0 : index
    %c0_2 = arith.constant 0 : index
    %1 = vector.load %arg1[%c0_1, %c0_2] : memref<24x16xf32, #tpu.memory_space<vmem>>, vector<8x8xf32>
    %c0_3 = arith.constant 0 : index
    %c8 = arith.constant 8 : index
    %2 = vector.load %arg1[%c0_3, %c8] : memref<24x16xf32, #tpu.memory_space<vmem>>, vector<8x1xf32>
    %c8_4 = arith.constant 8 : index
    %c0_5 = arith.constant 0 : index
    %3 = vector.load %arg1[%c8_4, %c0_5] : memref<24x16xf32, #tpu.memory_space<vmem>>, vector<8x8xf32>
    %c8_6 = arith.constant 8 : index
    %c8_7 = arith.constant 8 : index
    %4 = vector.load %arg1[%c8_6, %c8_7] : memref<24x16xf32, #tpu.memory_space<vmem>>, vector<8x1xf32>
    %c16 = arith.constant 16 : index
    %c0_8 = arith.constant 0 : index
    %5 = vector.load %arg1[%c16, %c0_8] : memref<24x16xf32, #tpu.memory_space<vmem>>, vector<8x8xf32>
    %c16_9 = arith.constant 16 : index
    %c8_10 = arith.constant 8 : index
    %6 = vector.load %arg1[%c16_9, %c8_10] : memref<24x16xf32, #tpu.memory_space<vmem>>, vector<8x1xf32>
    %cst = arith.constant dense<0.000000e+00> : vector<8x128xf32>
    %7 = tpu.matmul %1, %0, %cst {dimension_numbers = #tpu.dot_dimension_numbers<[1], [0], [0], [1], [0, 0, 1, 1], [], []>} : vector<8x8xf32>, vector<8x128xf32>, vector<8x128xf32> -> vector<8x128xf32>
    %8 = vector.broadcast %2 : vector<8x1xf32> to vector<8x128xf32>
    %9 = arith.addf %7, %8 : vector<8x128xf32>
    %cst_11 = arith.constant 0.000000e+00 : f32
    %10 = vector.broadcast %cst_11 : f32 to vector<8x128xf32>
    %11 = arith.maximumf %9, %10 : vector<8x128xf32>
    %cst_12 = arith.constant dense<0.000000e+00> : vector<8x128xf32>
    %12 = tpu.matmul %3, %11, %cst_12 {dimension_numbers = #tpu.dot_dimension_numbers<[1], [0], [0], [1], [0, 0, 1, 1], [], []>} : vector<8x8xf32>, vector<8x128xf32>, vector<8x128xf32> -> vector<8x128xf32>
    %13 = vector.broadcast %4 : vector<8x1xf32> to vector<8x128xf32>
    %14 = arith.addf %12, %13 : vector<8x128xf32>
    %cst_13 = arith.constant 0.000000e+00 : f32
    %15 = vector.broadcast %cst_13 : f32 to vector<8x128xf32>
    %16 = arith.maximumf %14, %15 : vector<8x128xf32>
    %cst_14 = arith.constant dense<0.000000e+00> : vector<8x128xf32>
    %17 = tpu.matmul %5, %16, %cst_14 {dimension_numbers = #tpu.dot_dimension_numbers<[1], [0], [0], [1], [0, 0, 1, 1], [], []>} : vector<8x8xf32>, vector<8x128xf32>, vector<8x128xf32> -> vector<8x128xf32>
    %18 = vector.broadcast %6 : vector<8x1xf32> to vector<8x128xf32>
    %19 = arith.addf %17, %18 : vector<8x128xf32>
    %20 = vector.extract_strided_slice %19 {offsets = [0, 0], sizes = [1, 128], strides = [1, 1]} : vector<8x128xf32> to vector<1x128xf32>
    %21 = arith.negf %20 : vector<1x128xf32>
    %22 = math.exp %21 : vector<1x128xf32>
    %cst_15 = arith.constant 1.000000e+00 : f32
    %23 = vector.broadcast %cst_15 : f32 to vector<1x128xf32>
    %24 = arith.addf %23, %22 : vector<1x128xf32>
    %25 = arith.divf %23, %24 : vector<1x128xf32>
    %c0_16 = arith.constant 0 : index
    %c0_17 = arith.constant 0 : index
    %26 = vector.load %arg3[%c0_16, %c0_17] : memref<1x128xf32, #tpu.memory_space<vmem>>, vector<1x128xf32>
    tpu.vector_store %arg3[%c0_16, %c0_17], %25 {strides = array<i32>} : memref<1x128xf32, #tpu.memory_space<vmem>>, vector<1x128xf32>,
    return
  }
  func.func @transform_0(%arg0: i32) -> (i32, i32) {
    %c0_i32 = arith.constant 0 : i32
    %c0_i32_0 = arith.constant 0 : i32
    %c0_i32_1 = arith.constant 0 : i32
    return %c0_i32, %c0_i32_0 : i32, i32
  }
  func.func @transform_1(%arg0: i32) -> (i32, i32) {
    %c0_i32 = arith.constant 0 : i32
    %c0_i32_0 = arith.constant 0 : i32
    return %c0_i32, %arg0 : i32, i32
  }
  func.func @transform_2(%arg0: i32) -> (i32, i32) {
    %c0_i32 = arith.constant 0 : i32
    %c0_i32_0 = arith.constant 0 : i32
    return %c0_i32, %arg0 : i32, i32
  }
}

</mosaic_0001>

<bundles_post_ra>
// kernel: tpu_custom_call.1
= control target key start
LH: loop header
LB: loop body
LE: loop exit
PB: predicated region body
PF: predicated region fallthrough
CT: control target
= control target key end

     0   :  { %7 = vsyncpa [#allocation3], 0  ;;  %s730_s0 = inlined_call_operand.vmem [shape: f32[24,16], index: 0, kind: input, shape index: {}]   ;;  %s731_s1 = inlined_call_operand.vmem [shape: f32[8,256], index: 1, kind: input, shape index: {}]   ;;  %s732_s2 = inlined_call_operand.hbm [shape: f32[1,256], index: 2, kind: output, shape index: {}]  }
   0x1   :  { %9 = vsyncpa [#allocation3 + $0x1], 0  ;;  %s615_s9 = smov 0   ;;  %s617_s10 = smov 0  }
   0x2   :  { %s619_s11 = smov 0   ;;  %s621_s12 = smov 0  }
   0x3 LB: > { %s636_s13 = sadd.s32 4294967295, %s594_s12   ;;  %s451_s14 = sadd.s32 4294967294, %s594_s12   ;;  %s594_s12 = sphi %s621_s12, %s738_s12   ;;  %s590_s11 = sphi %s619_s11, %s737_s11   ;;  %s586_s10 = sphi %s617_s10, %s736_s10   ;;  %s582_s9 = sphi %s615_s9, %s735_s9  }
   0x4   : > { %s640_s15 = sadd.s32 1, %s594_s12   ;;  %s69_s16 = sadd.s32 1, %s590_s11 }
   0x5   : > { %s66_s17 = ssub.s32 %s594_s12, %s640_s15  ;;  %p79_p0 = scmp.ne.s32.totalorder %s590_s11, %s586_s10 }
   0x6   : > { %p67_p1 = scmp.eq.s32.totalorder %s66_s17, 0  ;;  %p80_p2 = scmp.eq.s32.totalorder %s636_s13, 1 }
   0x7   : > { %p85_p3 = scmp.ne.s32.totalorder %s586_s10, %s582_s9  ;;  %p86_p4 = scmp.eq.s32.totalorder %s451_s14, 1 }
   0x8   : > { %s651_s18 = scalar_select %p67_p1, %s590_s11, %s69_s16  }
   0x9   : > { %p653_p5 = por %p80_p2, %p79_p0  ;;  %p657_p6 = por %p86_p4, %p85_p3 }
   0xa   : > { %p454_p7 = scmp.ge.s32.totalorder %s594_s12, 1  ;;  %p114_p8 = scmp.lt.s32.totalorder %s594_s12, 3 }
   0xc   : > { %p115_p9 = pnand %p454_p7, %p114_p8 }
   0xd   : > { %p134_p10 = scmp.lt.s32.totalorder (!%p115_p9), %s636_s13, 1  ;;  %v596_v0 = vmov (!%p115_p9), 0.0   ;;  %vm597_vm0 = vmmov (!%p115_p9), 0   ;;  %v139_v1 = vld [vmem:[%s730_s0] sm:$0xff] (!%p115_p9)  ;;  %v598_v2 = vmov (!%p115_p9), 8   ;;  %v140_v3 = vld [vmem:[%s730_s0 + $0x8] sm:$0xff] (!%p115_p9) }
   0xe   : > { %118 = sbr.rel (%p115_p9) target bundleno = 715 (0x2cb), region = 28  ;;  %469 = vmatprep.subr.mxu0 (!%p115_p9), %v596_v0  ;;  %471 = vmatprep.mubr.msk.f32.mxu0 (!%p115_p9), %vm597_vm0, %v596_v0  ;;  %vm147_vm1 = vcmask (!%p115_p9), 64512   ;;  %v141_v10 = vld [vmem:[%s730_s0 + $0x10] sm:$0xff] (!%p115_p9)  ;;  %s132_s4 = sand.u32 (!%p115_p9), 1, %s586_s10  }
   0xf   : > { %526 = vset.pattern.permute.xlu0 (!%p115_p9), %v598_v2  ;;  %474 = vmatprep.subr.mxu1 (!%p115_p9), %v596_v0  ;;  %s460_s5 = sshll.u32 (!%p115_p9), %s636_s13, 4  ;;  %s133_s6 = scalar_lea.vmem (!%p115_p9), [#allocation2], %s132_s4 }
  0x10   : > { %144 = vperm.xlu0 (!%p115_p9), %526, %v139_v1   ;;  %476 = vmatprep.mubr.msk.f32.mxu1 (!%p115_p9), %vm597_vm0, %v596_v0  ;;  %s396_s7 = sshll.u32 (!%p115_p9), %s133_s6, 4  ;;  %s688_s16 = scalar_lea.hbm (!%p115_p9), %s732_s2, %s460_s5  ;;  %s690_s7 = int_to_ptr.vmem [resolvable:$true] %s396_s7 }
  0x11   : > { %527 = vset.pattern.permute.xlu1 (!%p115_p9), %v598_v2  ;;  %s384_s17 = scalar_lea.sflag (!%p115_p9), [#allocation3], %s132_s4 }
  0x12   : > { %301 = vperm.xlu1 (!%p115_p9), %527, %v141_v10  }
  0x14   : > { %223 = vperm.xlu0 (!%p115_p9), %526, %v140_v3  }
  0x15   : > { %s135_s21 = scalar_select %p134_p10, %s636_s13, 1 }
  0x16   : > { %s599_s13 = smov [#allocation2]  }
  0x17   : > { %s455_s24 = sshll.u32 %s135_s21, 3  ;;  %s532_s21 = scalar_lea.vmem %s690_s7, 16 }
  0x18   : > { %s137_s29 = scalar_lea.vmem %s731_s1, %s455_s24  ;;  %p533_p11 = scmp.ne.s32.totalorder %s690_s7, %s532_s21 }
  0x19   : > { %v138_v4 = vld [vmem:[%s137_s29] sm:$0xff]  ;;  %s536_s22 = sshll.u32 %s599_s13, 4  ;;  %s537_s22 = int_to_ptr.vmem [resolvable:$false] %s536_s22 }
  0x1a   : > { %470 = vmatpush3.msra.mxu0 %v138_v4  ;;  %p534_p12 = pnand %p533_p11, %p653_p5  ;;  %s538_s23 = scalar_lea.vmem %s537_s22, 32 }
  0x1b   : > { %472 = vmatmul.mubr.msk.f32.vlgmr.msra.gmra.mrb[0].mxu0 %vm147_vm1, %v139_v1  ;;  %479 = vmatprep.subr.mxu0 %v596_v0  ;;  %p539_p0 = scmp.lt.s32.totalorder %s690_s7, %s537_s22  ;;  %p540_p1 = scmp.lt.s32.totalorder %s538_s23, %s532_s21 }
  0x1c   : > { %481 = vmatprep.mubr.msk.f32.mxu0 %vm597_vm0, %v596_v0  ;;  %p535_p13 = pneg %p534_p12 }
  0x1d   : > { %p541_p2 = por %p540_p1, %p539_p0 }
  0x1f   : > { %p542_p3 = pnand %p541_p2, %p535_p13 }
  0x8f   : > { %v145_v5 = vpop.permute.xlu0 %144 }
  0x91   : > { %v302_v16 = vpop.permute.xlu1 %301 }
  0x93   : > { %v224_v11 = vpop.permute.xlu0 %223 }
  0xee   : > { %v216_v6 = vpop.f32.mrb[0].mxu0 }
  0xef   : > { %v217_v7 = vadd.f32 %v216_v6, %v145_v5  ;;  %v473_v8 = vpop.f32.mrb[1].mxu0 }
  0xf1   : > { %v220_v9 = vmax.f32 %v217_v7, 0.0 }
  0xf3   : > { %475 = vmatpush3.msra.mxu1 %v220_v9 }
  0xf4   : > { %477 = vmatmul.mubr.msk.f32.vlgmr.msra.gmra.mrb[0].mxu1 %vm147_vm1, %v140_v3 }
 0x1c7   : > { %v294_v12 = vpop.f32.mrb[0].mxu1 }
 0x1c8   : > { %v295_v13 = vadd.f32 %v294_v12, %v224_v11  ;;  %v478_v14 = vpop.f32.mrb[1].mxu1 }
 0x1ca   : > { %v298_v15 = vmax.f32 %v295_v13, 0.0 }
 0x1cc   : > { %480 = vmatpush3.msra.mxu0 %v298_v15 }
 0x1cd   : > { %482 = vmatmul.mubr.msk.f32.vlgmr.msra.gmra.mrb[2].mxu0 %vm147_vm1, %v141_v10 }
 0x2a0   : > { %v372_v17 = vpop.f32.mrb[2].mxu0 }
 0x2a1   : > { %v373_v18 = vadd.f32 %v372_v17, %v302_v16  ;;  %v483_v19 = vpop.f32.mrb[3].mxu0 }
 0x2a3   : > { %v459_v20 = vmul.f32 -1.442695, %v373_v18 }
 0x2a5   : > { %528 = vpow2.f32 %v459_v20 }
 0x2af   : > { %v529_v21 = vpop.eup %528 }
 0x2b0   : > { %v379_v22 = vadd.f32 1.0, %v529_v21 }
 0x2b2   : > { %530 = vrcp.f32 %v379_v22 }
 0x2bc   : > { %v531_v23 = vpop.eup %530 }
 0x2bd   : > { %382 = vst [vmem:[%s133_s6] sm:$0x1] %v531_v23 }
 0x2be   : > { %545 = shalt.err (!%p542_p3)
}
 0x2bf   : > { %s546_s24 = scalar_lea.hbm %s688_s16, 16  ;;  %s550_s27 = scalar_lea.hbm %s732_s2, 32 }
 0x2c0   : > { %p547_p4 = scmp.ne.s32.totalorder %s688_s16, %s546_s24  ;;  %p551_p9 = scmp.lt.u32.totalorder %s688_s16, %s732_s2 }
 0x2c1   : > { %p552_p10 = scmp.lt.u32.totalorder %s550_s27, %s546_s24  ;;  %p554_p12 = scmp.lt.u32.totalorder %s546_s24, %s688_s16 }
 0x2c2   : > { %p548_p7 = pnand %p547_p4, %p653_p5 }
 0x2c3   : > { %p553_p11 = por %p552_p10, %p551_p9 }
 0x2c4   : > { %p549_p8 = pneg %p548_p7 }
 0x2c5   : > { %p555_p13 = por %p554_p12, %p553_p11 }
 0x2c7   : > { %p556_p0 = pnand %p555_p13, %p549_p8 }
 0x2c9   : > { %559 = shalt.err (!%p556_p0)
}
 0x2ca   : > { %484 = dma.vmem_to_hbm [thread:$0]  (%p653_p5), %s690_s7, 16, %s688_s16, %s384_s17  }
 0x2cb PF: > { %p490_p1 = scmp.ge.s32.totalorder %s594_s12, 2  ;;  %s408_s30 = sand.u32 1, %s582_s9  }
 0x2cc   : > { %s409_s3 = scalar_lea.sflag [#allocation3], %s408_s30 }
 0x2cd   : > { %p487_p2 = pnand %p490_p1, %p657_p6 }
 0x2cf   : > { %577 = dma.done.wait (!%p487_p2), %s409_s3, 16  }
 0x2d0   : > { %579 = vsyncadd (!%p487_p2), %s409_s3, 4294967280  ;;  %p12_p3 = scmp.ge.s32.totalorder %s640_s15, 4   ;;  %s735_s9 = smov %s586_s10 }
 0x2d1   : > { %s736_s10 = smov %s590_s11  ;;  %s737_s11 = smov %s651_s18 }
 0x2d2   : > { %s738_s12 = smov %s640_s15  ;;  %14 = sbr.rel (!%p12_p3) target bundleno = 3 (0x3), region = 63 }
 0x2d9   :  { %413 = vsyncpa [#allocation3], 1 }
 0x2da   :  { %415 = vsyncpa [#allocation3 + $0x1], 1 }

</bundles_post_ra>
